<compile_context>
chip_gen: v7x
topology: tpu7x:2x2x1
jax: 0.10.0
libtpu: 0.0.40
codegen_flags: <defaults>
</compile_context>

<pallas_src>
import functools
import math

import jax
import jax.numpy as jnp
from jax.experimental import pallas as pl
from jax.experimental.pallas import tpu as pltpu

_LANE = 128
_SUBLANE = 8


def _round_up(a, m):
    return ((a + m - 1) // m) * m


def _gelu(x, approximate):
    if approximate:
        # tanh-approx GELU: the transcendental goes to the EUP slot.
        return jax.nn.gelu(x, approximate=True)
    # exact erf GELU (matches PyTorch nn.GELU() default bit-for-bit closer).
    return 0.5 * x * (1.0 + jax.lax.erf(x * (1.0 / math.sqrt(2.0))))


def _layer_norm(x, gamma, beta, *, eps, inv_c, pad_lanes):
    """Two-pass LayerNorm over the true C channels of a zero-padded (T, Cp) tile."""
    mean = jnp.sum(x, axis=-1, keepdims=True) * inv_c
    centered = x - mean
    sq = jnp.sum(centered * centered, axis=-1, keepdims=True)
    # padded lanes (x == 0) each contributed mean^2 to `sq`; remove them exactly.
    var = jnp.maximum((sq - pad_lanes * mean * mean) * inv_c, 0.0)
    xn = centered * jax.lax.rsqrt(var + eps)
    # gamma/beta are zero-padded, so the padded lanes of the result are 0.
    return xn * gamma + beta


# --------------------------------------------------------------------------
# Kernels
# --------------------------------------------------------------------------
def _adapter_kernel_resident(x_ref, gamma_ref, beta_ref, w1_ref, b1_ref,
                             w2_ref, b2_ref, o_ref, *, eps, inv_c, pad_lanes,
                             approximate):
    """Both adapter weights fully resident in VMEM; 1-D row grid."""
    x = x_ref[...].astype(jnp.float32)                          # (T, Cp) f32
    y = _layer_norm(x, gamma_ref[...], beta_ref[...],
                    eps=eps, inv_c=inv_c, pad_lanes=pad_lanes)
    # bf16 MXU operands with f32 accumulation (intentional accuracy/perf tradeoff).
    h = jnp.dot(y.astype(jnp.bfloat16), w1_ref[...],
                preferred_element_type=jnp.float32) + b1_ref[...]
    h = _gelu(h, approximate)                                    # (T, Dp) f32
    a = jnp.dot(h.astype(jnp.bfloat16), w2_ref[...],
                preferred_element_type=jnp.float32) + b2_ref[...]
    o_ref[...] = (x + a).astype(o_ref.dtype)                     # residual add


def _adapter_kernel_dtiled(x_ref, gamma_ref, beta_ref, w1_ref, b1_ref,
                           w2_ref, b2_ref, o_ref, y_ref, acc_ref, *, eps,
                           inv_c, pad_lanes, approximate):
    """Weight-blocked fallback: inner 'arbitrary' grid axis tiles the adapter
    dim D (w1 column blocks / w2 row blocks) with a VMEM f32 accumulator."""
    d = pl.program_id(1)

    @pl.when(d == 0)
    def _():
        x = x_ref[...].astype(jnp.float32)
        y_ref[...] = _layer_norm(x, gamma_ref[...], beta_ref[...], eps=eps,
                                 inv_c=inv_c,
                                 pad_lanes=pad_lanes).astype(jnp.bfloat16)
        acc_ref[...] = jnp.zeros_like(acc_ref)

    h = jnp.dot(y_ref[...], w1_ref[...],
                preferred_element_type=jnp.float32) + b1_ref[...]
    h = _gelu(h, approximate)
    acc_ref[...] += jnp.dot(h.astype(jnp.bfloat16), w2_ref[...],
                            preferred_element_type=jnp.float32)

    @pl.when(d == pl.num_programs(1) - 1)
    def _():
        x = x_ref[...].astype(jnp.float32)
        o_ref[...] = (x + acc_ref[...] + b2_ref[...]).astype(o_ref.dtype)


# --------------------------------------------------------------------------
# One-time parameter preparation (hoisted out of the per-call path).
# --------------------------------------------------------------------------
def prepare_adapter_params(params, *, weight_dtype=jnp.bfloat16):
    """Pad params to lane multiples and pre-cast weights ONCE; cache the result."""
    C, D = params["w1"].shape
    Cp, Dp = _round_up(C, _LANE), _round_up(D, _LANE)
    f32 = jnp.float32

    def pad_vec(v, n):
        v = v.reshape(1, -1).astype(f32)
        return jnp.pad(v, ((0, 0), (0, n - v.shape[1])))

    # TODO(synk): optional fp8 (e4m3) weight path for v7x's MXU, behind a flag.
    w1 = jnp.pad(params["w1"].astype(f32),
                 ((0, Cp - C), (0, Dp - D))).astype(weight_dtype)
    w2 = jnp.pad(params["w2"].astype(f32),
                 ((0, Dp - D), (0, Cp - C))).astype(weight_dtype)
    return {
        "C": C, "D": D, "Cp": Cp, "Dp": Dp,
        "gamma": pad_vec(params["gamma"], Cp),
        "beta": pad_vec(params["beta"], Cp),
        "b1": pad_vec(params["b1"], Dp),
        "b2": pad_vec(params["b2"], Cp),
        "w1": w1, "w2": w2,
    }


# --------------------------------------------------------------------------
# Tiling heuristics
# --------------------------------------------------------------------------
def _vmem_capacity_bytes():
    try:
        return int(pltpu.get_tpu_info().vmem_capacity_bytes)
    except Exception:
        return 64 << 20  # conservative default (v7x is 64 MiB per TensorCore)


def _choose_row_tile(n_rows, requested, gran):
    """Largest row tile (multiple of `gran`, <= requested) that divides the
    (gran-aligned) row count; prefer an even step count (v7x 2-TC balance)."""
    requested = max(gran, (requested // gran) * gran)
    n_al = _round_up(max(n_rows, 1), gran)
    upper = min(requested, n_al)
    best_any = best_even = None
    for t in range(upper, gran - 1, -gran):
        if n_al % t == 0:
            if best_any is None:
                best_any = t
            if (n_al // t) % 2 == 0:
                best_even = t
                break
    if best_any is None:
        return upper                       # no divisor: rows get zero-padded
    if best_even is not None and best_even * 2 >= best_any:
        return best_even
    return best_any


def _choose_d_tile(Cp, Dp, limit_bytes, w_itemsize):
    """Largest multiple-of-128 divisor of Dp keeping per-step weight blocks
    (w1 col block + w2 row block) within `limit_bytes`."""
    per_td = 2 * Cp * w_itemsize
    if per_td * Dp <= limit_bytes:
        return Dp
    target = max(_LANE, (int(limit_bytes // per_td) // _LANE) * _LANE)
    for td in range(min(target, Dp), _LANE - 1, -_LANE):
        if Dp % td == 0:
            return td
    return _LANE


# --------------------------------------------------------------------------
# Forward
# --------------------------------------------------------------------------
def _forward(x, gamma, beta, w1, b1, w2, b2, *, C, D, Cp, Dp, eps, row_tile,
             gelu_approximate, weight_vmem_limit_bytes):
    orig_shape = x.shape
    assert orig_shape[-1] == C, "last dim must equal channels"
    N = max(1, math.prod(orig_shape[:-1]))
    x2d = x.reshape(N, C)                              # NATIVE dtype: no f32 cast

    x_item = jnp.dtype(x.dtype).itemsize
    w_item = jnp.dtype(w1.dtype).itemsize
    cap = _vmem_capacity_bytes()

    # Weight (D-)tiling: keep resident weights within ~cap/4 (v7x 64 MiB/TC).
    w_limit = weight_vmem_limit_bytes
    if w_limit is None:
        w_limit = max(8 << 20, cap // 4)
    td = _choose_d_tile(Cp, Dp, w_limit, w_item)
    nd = Dp // td

    # Row tiling: large lane-dense tiles, bounded by VMEM, even step count.
    per_row = Cp * (4 * x_item + 14) + td * 8          # bufs + scratch + temps
    max_tile = max(_SUBLANE, (cap // 2) // max(per_row, 1))
    gran = max(_SUBLANE, 32 // x_item)                 # (8/16/32, 128) tiling
    tile = _choose_row_tile(N, min(row_tile, max_tile), gran)
    Np = _round_up(N, tile)
    ni = Np // tile

    # Pad only when needed (common production case: no pad, no unpad slice).
    # TODO(synk): mask the last row-tile's store in-kernel instead of padding
    # when only N is ragged.
    padded = (Np != N) or (Cp != C)
    if padded:
        x2d = jnp.pad(x2d, ((0, Np - N), (0, Cp - C)))

    common = dict(eps=eps, inv_c=1.0 / C, pad_lanes=float(Cp - C),
                  approximate=gelu_approximate)
    resident = pl.Buffered(1)      # constant-index operands: single buffer

    if nd == 1:
        kernel = functools.partial(_adapter_kernel_resident, **common)
        grid = (ni,)
        in_specs = [
            pl.BlockSpec((tile, Cp), lambda i: (i, 0)),                            # x rows
            pl.BlockSpec((1, Cp), lambda i: (0, 0), pipeline_mode=resident),       # gamma
            pl.BlockSpec((1, Cp), lambda i: (0, 0), pipeline_mode=resident),       # beta
            pl.BlockSpec((Cp, Dp), lambda i: (0, 0), pipeline_mode=resident),      # w1
            pl.BlockSpec((1, Dp), lambda i: (0, 0), pipeline_mode=resident),       # b1
            pl.BlockSpec((Dp, Cp), lambda i: (0, 0), pipeline_mode=resident),      # w2
            pl.BlockSpec((1, Cp), lambda i: (0, 0), pipeline_mode=resident),       # b2
        ]
        out_specs = pl.BlockSpec((tile, Cp), lambda i: (i, 0))
        scratch = []
        dim_sem = ("parallel",)
    else:
        kernel = functools.partial(_adapter_kernel_dtiled, **common)
        grid = (ni, nd)
        in_specs = [
            pl.BlockSpec((tile, Cp), lambda i, d: (i, 0)),                         # x rows
            pl.BlockSpec((1, Cp), lambda i, d: (0, 0), pipeline_mode=resident),    # gamma
            pl.BlockSpec((1, Cp), lambda i, d: (0, 0), pipeline_mode=resident),    # beta
            pl.BlockSpec((Cp, td), lambda i, d: (0, d)),                           # w1 cols
            pl.BlockSpec((1, td), lambda i, d: (0, d)),                            # b1
            pl.BlockSpec((td, Cp), lambda i, d: (d, 0)),                           # w2 rows
            pl.BlockSpec((1, Cp), lambda i, d: (0, 0), pipeline_mode=resident),    # b2
        ]
        out_specs = pl.BlockSpec((tile, Cp), lambda i, d: (i, 0))
        scratch = [pltpu.VMEM((tile, Cp), jnp.bfloat16),     # LN output (reused)
                   pltpu.VMEM((tile, Cp), jnp.float32)]      # accumulator
        dim_sem = ("parallel", "arbitrary")

    # VMEM limit: real footprint + slack, clamped below physical VMEM.
    weights_resident = 2 * Cp * td * w_item * (1 if nd == 1 else 2)
    vec_bytes = (3 * Cp + Dp) * 4
    tiles_bytes = tile * Cp * 4 * x_item                 # in + out, double-buffered
    scratch_bytes = tile * Cp * 6 if nd > 1 else 0
    temp_bytes = tile * (Cp + td) * 8
    need = weights_resident + vec_bytes + tiles_bytes + scratch_bytes + temp_bytes
    vmem_limit = int(min(max(need + (16 << 20), 32 << 20), cap - (8 << 20)))

    cost = pl.CostEstimate(
        flops=4 * Np * Cp * Dp,                          # two matmuls
        transcendentals=Np * Dp,                         # GELU
        bytes_accessed=(Np * Cp * 2 * x_item             # x in + out (real dtypes)
                        + 2 * Cp * Dp * w_item + vec_bytes),
    )

    out2d = pl.pallas_call(
        kernel,
        out_shape=jax.ShapeDtypeStruct((Np, Cp), x.dtype),
        grid_spec=pltpu.PrefetchScalarGridSpec(
            num_scalar_prefetch=0,
            grid=grid,
            in_specs=in_specs,
            out_specs=out_specs,
            scratch_shapes=scratch,
        ),
        compiler_params=pltpu.CompilerParams(
            dimension_semantics=dim_sem,
            vmem_limit_bytes=vmem_limit),
        cost_estimate=cost,
    )(x2d, gamma, beta, w1, b1, w2, b2)

    if padded:
        out2d = out2d[:N, :C]
    return out2d.reshape(orig_shape)


def make_dynamic_adapter_block(params, *, eps=1e-5, row_tile=512,
                               gelu_approximate=True,
                               weight_vmem_limit_bytes=None):
    """Prepare (pad + bf16-cast) params once and return a jitted forward fn."""
    prep = prepare_adapter_params(params)
    fwd = functools.partial(
        _forward, C=prep["C"], D=prep["D"], Cp=prep["Cp"], Dp=prep["Dp"],
        eps=eps, row_tile=row_tile, gelu_approximate=gelu_approximate,
        weight_vmem_limit_bytes=weight_vmem_limit_bytes)
    jitted = jax.jit(fwd)

    def apply(x):
        return jitted(x, prep["gamma"], prep["beta"], prep["w1"], prep["b1"],
                      prep["w2"], prep["b2"])
    return apply


def dynamic_adapter_block(x, params, *, eps=1e-5, row_tile=512,
                          gelu_approximate=True):
    """One-shot convenience wrapper (re-prepares params each call; prefer
    make_dynamic_adapter_block for repeated use)."""
    return make_dynamic_adapter_block(
        params, eps=eps, row_tile=row_tile,
        gelu_approximate=gelu_approximate)(x)


# --------------------------------------------------------------------------
# Init / reference / test
# --------------------------------------------------------------------------
def init_params(key, channels, expansion_ratio=4):
    adapter_dim = int(channels // expansion_ratio)
    k1, k2, k3, k4 = jax.random.split(key, 4)
    bound1 = 1.0 / math.sqrt(channels)
    bound2 = 1.0 / math.sqrt(adapter_dim)
    return {
        "gamma": jnp.ones((channels,), jnp.float32),
        "beta": jnp.zeros((channels,), jnp.float32),
        "w1": jax.random.uniform(k1, (channels, adapter_dim), jnp.float32,
                                 -bound1, bound1),
        "b1": jax.random.uniform(k2, (adapter_dim,), jnp.float32, -bound1, bound1),
        "w2": jax.random.uniform(k3, (adapter_dim, channels), jnp.float32,
                                 -bound2, bound2),
        "b2": jax.random.uniform(k4, (channels,), jnp.float32, -bound2, bound2),
    }


def _reference(x, p, eps=1e-5, gelu_approximate=True):
    x = x.astype(jnp.float32)
    mean = jnp.mean(x, axis=-1, keepdims=True)
    var = jnp.mean((x - mean) ** 2, axis=-1, keepdims=True)
    y = (x - mean) / jnp.sqrt(var + eps) * p["gamma"] + p["beta"]
    h = _gelu(y @ p["w1"] + p["b1"], gelu_approximate)
    return x + h @ p["w2"] + p["b2"]


if __name__ == "__main__":
    key = jax.random.PRNGKey(0)
    kx, kp, kx2, kp2 = jax.random.split(key, 4)

    # Small shapes (C=32 -> lane-padding path); exercise both GELU variants.
    B, S, C = 2, 8, 32
    x = jax.random.normal(kx, (B, S, C), jnp.float32)
    params = init_params(kp, C, expansion_ratio=4)

    for approx in (True, False):
        fwd = make_dynamic_adapter_block(params, gelu_approximate=approx)
        out = jax.block_until_ready(fwd(x))
        ref = _reference(x, params, gelu_approximate=approx)
        assert out.shape == ref.shape
        # bf16 MXU operands (f32 accumulation) => relaxed tolerance vs f32 ref.
        assert jnp.allclose(out, ref, atol=3e-2, rtol=3e-2), \
            f"mismatch vs reference (gelu_approximate={approx})"

    # bf16 activations: native-dtype DMA path (half the input HBM traffic).
    xb = x.astype(jnp.bfloat16)
    outb = jax.block_until_ready(make_dynamic_adapter_block(params)(xb))
    assert outb.shape == xb.shape
    assert bool(jnp.all(jnp.isfinite(outb.astype(jnp.float32))))

    # Lane-aligned C (no pad fast path) + forced small weight-VMEM limit to
    # exercise the D-tiled (weight-blocked) fallback kernel (grid (ni, nd>1)).
    B2, S2, C2 = 2, 8, 1024
    x2 = jax.random.normal(kx2, (B2, S2, C2), jnp.float32)
    params2 = init_params(kp2, C2, expansion_ratio=4)   # adapter_dim = 256
    fwd2 = make_dynamic_adapter_block(params2,
                                      weight_vmem_limit_bytes=600 * 1024)
    out2 = jax.block_until_ready(fwd2(x2))
    ref2 = _reference(x2, params2)
    assert out2.shape == ref2.shape
    assert jnp.allclose(out2, ref2, atol=5e-2, rtol=5e-2), \
        "mismatch vs reference (D-tiled path)"

    print("KERNEL_OK")
</pallas_src>

<mosaic_0001>
module attributes {stable_mosaic.version = 11 : i64} {
  func.func @_adapter_kernel_resident(%arg0: i32, %arg1: memref<8x128xf32, #tpu.memory_space<vmem>>, %arg2: memref<1x128xf32, #tpu.memory_space<vmem>>, %arg3: memref<1x128xf32, #tpu.memory_space<vmem>>, %arg4: memref<128x128xbf16, #tpu.memory_space<vmem>>, %arg5: memref<1x128xf32, #tpu.memory_space<vmem>>, %arg6: memref<128x128xbf16, #tpu.memory_space<vmem>>, %arg7: memref<1x128xf32, #tpu.memory_space<vmem>>, %arg8: memref<8x128xf32, #tpu.memory_space<vmem>>) attributes {dimension_semantics = [#tpu.dimension_semantics<parallel>], iteration_bounds = array<i64: 2>, scalar_prefetch = 0 : i64, scratch_operands = 0 : i64, tpu.core_type = #tpu.core_type<tc>, window_params = [{transform_indices = @transform_0, window_bounds = array<i64: 8, 128>}, {pipeline_mode = #tpu.pipeline_mode<synchronous>, transform_indices = @transform_1, window_bounds = array<i64: 1, 128>}, {pipeline_mode = #tpu.pipeline_mode<synchronous>, transform_indices = @transform_2, window_bounds = array<i64: 1, 128>}, {pipeline_mode = #tpu.pipeline_mode<synchronous>, transform_indices = @transform_3, window_bounds = array<i64: 128, 128>}, {pipeline_mode = #tpu.pipeline_mode<synchronous>, transform_indices = @transform_4, window_bounds = array<i64: 1, 128>}, {pipeline_mode = #tpu.pipeline_mode<synchronous>, transform_indices = @transform_5, window_bounds = array<i64: 128, 128>}, {pipeline_mode = #tpu.pipeline_mode<synchronous>, transform_indices = @transform_6, window_bounds = array<i64: 1, 128>}, {transform_indices = @transform_7, window_bounds = array<i64: 8, 128>}]} {
    %c0 = arith.constant 0 : index
    %c0_0 = arith.constant 0 : index
    %0 = vector.load %arg1[%c0, %c0_0] : memref<8x128xf32, #tpu.memory_space<vmem>>, vector<8x128xf32>
    %c0_1 = arith.constant 0 : index
    %c0_2 = arith.constant 0 : index
    %1 = vector.load %arg2[%c0_1, %c0_2] : memref<1x128xf32, #tpu.memory_space<vmem>>, vector<1x128xf32>
    %c0_3 = arith.constant 0 : index
    %c0_4 = arith.constant 0 : index
    %2 = vector.load %arg3[%c0_3, %c0_4] : memref<1x128xf32, #tpu.memory_space<vmem>>, vector<1x128xf32>
    %cst = arith.constant dense<0.000000e+00> : vector<8xf32>
    %3 = vector.multi_reduction <add>, %0, %cst [1] : vector<8x128xf32> to vector<8xf32>
    %4 = vector.shape_cast %3 : vector<8xf32> to vector<8x1xf32>
    %cst_5 = arith.constant 3.125000e-02 : f32
    %5 = vector.broadcast %cst_5 : f32 to vector<8x1xf32>
    %6 = arith.mulf %4, %5 : vector<8x1xf32>
    %7 = vector.broadcast %6 : vector<8x1xf32> to vector<8x128xf32>
    %8 = arith.subf %0, %7 : vector<8x128xf32>
    %9 = arith.mulf %8, %8 : vector<8x128xf32>
    %cst_6 = arith.constant dense<0.000000e+00> : vector<8xf32>
    %10 = vector.multi_reduction <add>, %9, %cst_6 [1] : vector<8x128xf32> to vector<8xf32>
    %11 = vector.shape_cast %10 : vector<8xf32> to vector<8x1xf32>
    %cst_7 = arith.constant 9.600000e+01 : f32
    %12 = vector.broadcast %cst_7 : f32 to vector<8x1xf32>
    %13 = arith.mulf %12, %6 : vector<8x1xf32>
    %14 = arith.mulf %13, %6 : vector<8x1xf32>
    %15 = arith.subf %11, %14 : vector<8x1xf32>
    %cst_8 = arith.constant 3.125000e-02 : f32
    %16 = vector.broadcast %cst_8 : f32 to vector<8x1xf32>
    %17 = arith.mulf %15, %16 : vector<8x1xf32>
    %cst_9 = arith.constant 0.000000e+00 : f32
    %18 = vector.broadcast %cst_9 : f32 to vector<8x1xf32>
    %19 = arith.maximumf %17, %18 : vector<8x1xf32>
    %cst_10 = arith.constant 9.99999974E-6 : f32
    %20 = vector.broadcast %cst_10 : f32 to vector<8x1xf32>
    %21 = arith.addf %19, %20 : vector<8x1xf32>
    %22 = math.rsqrt %21 : vector<8x1xf32>
    %23 = vector.broadcast %22 : vector<8x1xf32> to vector<8x128xf32>
    %24 = arith.mulf %8, %23 : vector<8x128xf32>
    %25 = vector.broadcast %1 : vector<1x128xf32> to vector<8x128xf32>
    %26 = arith.mulf %24, %25 : vector<8x128xf32>
    %27 = vector.broadcast %2 : vector<1x128xf32> to vector<8x128xf32>
    %28 = arith.addf %26, %27 : vector<8x128xf32>
    %29 = arith.truncf %28 : vector<8x128xf32> to vector<8x128xbf16>
    %c0_11 = arith.constant 0 : index
    %c0_12 = arith.constant 0 : index
    %30 = vector.load %arg4[%c0_11, %c0_12] : memref<128x128xbf16, #tpu.memory_space<vmem>>, vector<128x128xbf16>
    %cst_13 = arith.constant dense<0.000000e+00> : vector<8x128xf32>
    %31 = tpu.matmul %29, %30, %cst_13 {dimension_numbers = #tpu.dot_dimension_numbers<[1], [0], [0], [1], [0, 0, 1, 1], [], []>} : vector<8x128xbf16>, vector<128x128xbf16>, vector<8x128xf32> -> vector<8x128xf32>
    %c0_14 = arith.constant 0 : index
    %c0_15 = arith.constant 0 : index
    %32 = vector.load %arg5[%c0_14, %c0_15] : memref<1x128xf32, #tpu.memory_space<vmem>>, vector<1x128xf32>
    %33 = vector.broadcast %32 : vector<1x128xf32> to vector<8x128xf32>
    %34 = arith.addf %31, %33 : vector<8x128xf32>
    %35 = arith.mulf %34, %34 : vector<8x128xf32>
    %36 = arith.mulf %34, %35 : vector<8x128xf32>
    %cst_16 = arith.constant 4.471500e-02 : f32
    %37 = vector.broadcast %cst_16 : f32 to vector<8x128xf32>
    %38 = arith.mulf %37, %36 : vector<8x128xf32>
    %39 = arith.addf %34, %38 : vector<8x128xf32>
    %cst_17 = arith.constant 0.797884583 : f32
    %40 = vector.broadcast %cst_17 : f32 to vector<8x128xf32>
    %41 = arith.mulf %40, %39 : vector<8x128xf32>
    %42 = math.tanh %41 : vector<8x128xf32>
    %cst_18 = arith.constant 1.000000e+00 : f32
    %43 = vector.broadcast %cst_18 : f32 to vector<8x128xf32>
    %44 = arith.addf %43, %42 : vector<8x128xf32>
    %cst_19 = arith.constant 5.000000e-01 : f32
    %45 = vector.broadcast %cst_19 : f32 to vector<8x128xf32>
    %46 = arith.mulf %45, %44 : vector<8x128xf32>
    %47 = arith.mulf %34, %46 : vector<8x128xf32>
    %48 = arith.truncf %47 : vector<8x128xf32> to vector<8x128xbf16>
    %c0_20 = arith.constant 0 : index
    %c0_21 = arith.constant 0 : index
    %49 = vector.load %arg6[%c0_20, %c0_21] : memref<128x128xbf16, #tpu.memory_space<vmem>>, vector<128x128xbf16>
    %cst_22 = arith.constant dense<0.000000e+00> : vector<8x128xf32>
    %50 = tpu.matmul %48, %49, %cst_22 {dimension_numbers = #tpu.dot_dimension_numbers<[1], [0], [0], [1], [0, 0, 1, 1], [], []>} : vector<8x128xbf16>, vector<128x128xbf16>, vector<8x128xf32> -> vector<8x128xf32>
    %c0_23 = arith.constant 0 : index
    %c0_24 = arith.constant 0 : index
    %51 = vector.load %arg7[%c0_23, %c0_24] : memref<1x128xf32, #tpu.memory_space<vmem>>, vector<1x128xf32>
    %52 = vector.broadcast %51 : vector<1x128xf32> to vector<8x128xf32>
    %53 = arith.addf %50, %52 : vector<8x128xf32>
    %54 = arith.addf %0, %53 : vector<8x128xf32>
    %c0_25 = arith.constant 0 : index
    %c0_26 = arith.constant 0 : index
    %55 = vector.load %arg8[%c0_25, %c0_26] : memref<8x128xf32, #tpu.memory_space<vmem>>, vector<8x128xf32>
    tpu.vector_store %arg8[%c0_25, %c0_26], %54 {strides = array<i32>} : memref<8x128xf32, #tpu.memory_space<vmem>>, vector<8x128xf32>,
    return
  }
  func.func @transform_0(%arg0: i32) -> (i32, i32) {
    %c0_i32 = arith.constant 0 : i32
    %c0_i32_0 = arith.constant 0 : i32
    return %arg0, %c0_i32 : i32, i32
  }
  func.func @transform_1(%arg0: i32) -> (i32, i32) {
    %c0_i32 = arith.constant 0 : i32
    %c0_i32_0 = arith.constant 0 : i32
    %c0_i32_1 = arith.constant 0 : i32
    return %c0_i32, %c0_i32_0 : i32, i32
  }
  func.func @transform_2(%arg0: i32) -> (i32, i32) {
    %c0_i32 = arith.constant 0 : i32
    %c0_i32_0 = arith.constant 0 : i32
    %c0_i32_1 = arith.constant 0 : i32
    return %c0_i32, %c0_i32_0 : i32, i32
  }
  func.func @transform_3(%arg0: i32) -> (i32, i32) {
    %c0_i32 = arith.constant 0 : i32
    %c0_i32_0 = arith.constant 0 : i32
    %c0_i32_1 = arith.constant 0 : i32
    return %c0_i32, %c0_i32_0 : i32, i32
  }
  func.func @transform_4(%arg0: i32) -> (i32, i32) {
    %c0_i32 = arith.constant 0 : i32
    %c0_i32_0 = arith.constant 0 : i32
    %c0_i32_1 = arith.constant 0 : i32
    return %c0_i32, %c0_i32_0 : i32, i32
  }
  func.func @transform_5(%arg0: i32) -> (i32, i32) {
    %c0_i32 = arith.constant 0 : i32
    %c0_i32_0 = arith.constant 0 : i32
    %c0_i32_1 = arith.constant 0 : i32
    return %c0_i32, %c0_i32_0 : i32, i32
  }
  func.func @transform_6(%arg0: i32) -> (i32, i32) {
    %c0_i32 = arith.constant 0 : i32
    %c0_i32_0 = arith.constant 0 : i32
    %c0_i32_1 = arith.constant 0 : i32
    return %c0_i32, %c0_i32_0 : i32, i32
  }
  func.func @transform_7(%arg0: i32) -> (i32, i32) {
    %c0_i32 = arith.constant 0 : i32
    %c0_i32_0 = arith.constant 0 : i32
    return %arg0, %c0_i32 : i32, i32
  }
}

</mosaic_0001>

<bundles_post_ra>
// kernel: _forward.1
= control target key start
LH: loop header
LB: loop body
LE: loop exit
PB: predicated region body
PF: predicated region fallthrough
CT: control target
= control target key end

     0   :  { %12 = vsyncpa [#allocation3], 0  ;;  %s1044_s0 = inlined_call_operand.vmem [shape: f32[16,128], index: 0, kind: input, shape index: {}]   ;;  %s1045_s1 = inlined_call_operand.vmem [shape: f32[1,128], index: 1, kind: input, shape index: {}]   ;;  %s1046_s2 = inlined_call_operand.vmem [shape: f32[1,128], index: 2, kind: input, shape index: {}]   ;;  %s1047_s3 = inlined_call_operand.hbm [shape: bf16[128,128], index: 3, kind: input, shape index: {}]   ;;  %s1048_s4 = inlined_call_operand.vmem [shape: f32[1,128], index: 4, kind: input, shape index: {}]   ;;  %s1049_s5 = inlined_call_operand.hbm [shape: bf16[128,128], index: 5, kind: input, shape index: {}]   ;;  %s1050_s6 = inlined_call_operand.vmem [shape: f32[1,128], index: 6, kind: input, shape index: {}]   ;;  %s1051_s7 = inlined_call_operand.vmem [shape: f32[16,128], index: 7, kind: output, shape index: {}]  }
   0x1   :  { %13 = vsyncpa [#allocation5], 0  ;;  %s909_s24 = smov 0  }
   0x2 LB: > { %s915_s25 = sadd.s32 4294967295, %s861_s24   ;;  %p649_p0 = scmp.ge.s32.totalorder %s861_s24, 1  ;;  %s861_s24 = sphi %s909_s24, %s19_s24  }
   0x3   : > { %p202_p1 = scmp.lt.s32.totalorder %s861_s24, 3  ;;  %s863_s26 = smov [#allocation2]  }
   0x4   : > { %s220_s27 = sshll.u32 %s863_s26, 4  ;;  %p1052_p3 = scmp.eq.s32.totalorder %s915_s25, 0  ;;  %s221_s27 = int_to_ptr.vmem [resolvable:$true] %s220_s27 }
   0x5   : > { %p919_p2 = pnand %p649_p0, %p202_p1  ;;  %s864_s29 = smov [#allocation4]  }
   0x6   : > { %s236_s30 = sshll.u32 %s864_s29, 4  ;;  %s791_s11 = scalar_lea.hbm %s1047_s3, 1024  ;;  %s932_s30 = int_to_ptr.vmem [resolvable:$true] %s236_s30 }
   0x7   : > { %s1054_s28 = scalar_select %p919_p2, 1, 0 }
   0x8   : > { %p746_p4 = pneg %p919_p2  ;;  %p792_p6 = scmp.ne.s32.totalorder %s1047_s3, %s791_s11 }
   0x9   : > { %p798_p10 = scmp.lt.u32.totalorder %s791_s11, %s1047_s3 }
   0xa   : > { %p928_p5 = pnand %p1052_p3, %p746_p4 }
   0xc   : > { %p793_p7 = pneg %p928_p5 }
   0xe   : > { %p794_p8 = pnand %p793_p7, %p792_p6 }
  0x10   : > { %p795_p9 = pneg %p794_p8 }
  0x12   : > { %p800_p11 = pnand %p798_p10, %p795_p9 }
  0x14   : > { %803 = shalt.err (!%p800_p11)
}
  0x15   : > { %s804_s16 = scalar_lea.vmem %s221_s27, 1024  ;;  %p812_p1 = scmp.lt.s32.totalorder %s221_s27, %s221_s27 }
  0x16   : > { %p805_p12 = scmp.ne.s32.totalorder %s221_s27, %s804_s16  ;;  %p813_p4 = scmp.lt.s32.totalorder %s804_s16, %s804_s16 }
  0x18   : > { %p807_p13 = pnand %p805_p12, %p793_p7  ;;  %p814_p3 = por %p813_p4, %p812_p1 }
  0x1a   : > { %p808_p0 = pneg %p807_p13 }
  0x1c   : > { %p815_p2 = pnand %p814_p3, %p808_p0 }
  0x1e   : > { %818 = shalt.err (!%p815_p2)
}
  0x1f   : > { %s865_s17 = smov 64   ;;  %s866_s18 = smov 4  }
  0x20   : > { %749 = dma.hbm_to_vmem [thread:$0]  (!%p928_p5), %s1047_s3, 1024, %s221_s27, [#allocation3], %s865_s17, %s865_s17, %s866_s18  }
  0x21   : > { %s819_s23 = scalar_lea.hbm %s1049_s5, 1024 }
  0x22   : > { %p820_p6 = scmp.ne.s32.totalorder %s1049_s5, %s819_s23  ;;  %p826_p8 = scmp.lt.u32.totalorder %s819_s23, %s1049_s5 }
  0x24   : > { %p822_p2 = pnand %p820_p6, %p793_p7 }
  0x26   : > { %p823_p3 = pneg %p822_p2 }
  0x28   : > { %p828_p9 = pnand %p826_p8, %p823_p3 }
  0x2a   : > { %831 = shalt.err (!%p828_p9)
}
  0x2b   : > { %s832_s27 = scalar_lea.vmem %s932_s30, 1024  ;;  %p840_p13 = scmp.lt.s32.totalorder %s932_s30, %s932_s30 }
  0x2c   : > { %p833_p10 = scmp.ne.s32.totalorder %s932_s30, %s832_s27  ;;  %p841_p0 = scmp.lt.s32.totalorder %s832_s27, %s832_s27 }
  0x2e   : > { %p835_p11 = pnand %p833_p10, %p793_p7  ;;  %p842_p1 = por %p841_p0, %p840_p13 }
  0x30   : > { %p836_p12 = pneg %p835_p11 }
  0x32   : > { %p843_p4 = pnand %p842_p1, %p836_p12 }
  0x34   : > { %846 = shalt.err (!%p843_p4)
}
  0x35   : > { %752 = dma.hbm_to_vmem [thread:$0]  (!%p928_p5), %s1049_s5, 1024, %s932_s30, [#allocation5], %s865_s17, %s865_s17, %s866_s18  }
  0x36   : > { %p1056_p6 = scmp.ne.s32.totalorder %s1054_s28, 0 }
  0x37   : > { %p1057_p2 = scmp.eq.s32.totalorder (!%p1056_p6), %s915_s25, 0 }
  0x38   : > { %262 = sbr.rel (%p1056_p6) target bundleno = 850 (0x352), region = 48 }
  0x3f   : > { %852 = dma.done.wait (%p1057_p2), [#allocation3], 1024   ;;  %p1058_p7 = pmov %p1057_p2 }
  0x40   : > { %p1059_p3 = pmov %p1057_p2 }
  0x41   : > { %854 = vsyncadd (%p1058_p7), [#allocation3], 4294966272 }
  0x42   : > { %856 = dma.done.wait (%p1059_p3), [#allocation5], 1024   ;;  %p1060_p8 = pmov %p1057_p2 }
  0x43   : > { %p296_p9 = scmp.lt.s32.totalorder %s915_s25, 1  ;;  %v771_v1 = vld [vmem:[#allocation2] sm:$0xff]   ;;  %v867_v2 = vmov 0.0   ;;  %v772_v7 = vld [vmem:[#allocation2 + $0x8] sm:$0xff]   ;;  %v773_v8 = vld [vmem:[#allocation2 + $0x10] sm:$0xff]   ;;  %vm868_vm0 = vmmov 0  }
  0x44   : > { %858 = vsyncadd (%p1060_p8), [#allocation5], 4294966272  ;;  %698 = vmatprep.subr.bf16.mxu0 %v867_v2  ;;  %718 = vmatprep.subr.bf16.mxu1 %v867_v2  ;;  %v774_v9 = vld [vmem:[#allocation2 + $0x18] sm:$0xff]   ;;  %v775_v10 = vld [vmem:[#allocation2 + $0x20] sm:$0xff]  }
  0x45   : > { %s1062_s25 = smov (!%p296_p9, %s915_s25), 1  ;;  %699 = vmatpush3.bf16.msra.mxu0 %v771_v1  ;;  %714 = vmatprep.mubr.msk.bf16.mxu0 %vm868_vm0, %v867_v2  ;;  %v776_v11 = vld [vmem:[#allocation2 + $0x28] sm:$0xff]   ;;  %v777_v12 = vld [vmem:[#allocation2 + $0x30] sm:$0xff]   ;;  %v778_v13 = vld [vmem:[#allocation2 + $0x38] sm:$0xff]  }
  0x46   : > { %s656_s28 = sshll.u32 %s1062_s25, 3  ;;  %700 = vmatprep.subr.bf16.mxu0 %v867_v2  ;;  %734 = vmatprep.mubr.msk.bf16.mxu1 %vm868_vm0, %v867_v2  ;;  %v658_v22 = vld [vmem:[%s1045_s1] ss:$0 sm:$0xff]  ;;  %v780_v29 = vld [vmem:[#allocation4 + $0x8] sm:$0xff]   ;;  %v781_v30 = vld [vmem:[#allocation4 + $0x10] sm:$0xff]  }
  0x47   : > { %s299_s13 = scalar_lea.vmem %s1044_s0, %s656_s28  ;;  %v659_v24 = vld [vmem:[%s1046_s2] ss:$0 sm:$0xff]  ;;  %v782_v31 = vld [vmem:[#allocation4 + $0x18] sm:$0xff]   ;;  %v784_v33 = vld [vmem:[#allocation4 + $0x28] sm:$0xff]   ;;  %s303_s26 = scalar_lea.vmem %s1051_s7, %s656_s28 }
  0x48   : > { %v1001_v0 = vld [vmem:[%s299_s13] sm:$0xff]  ;;  %v785_v34 = vld [vmem:[#allocation4 + $0x30] sm:$0xff]   ;;  %v786_v35 = vld [vmem:[#allocation4 + $0x38] sm:$0xff]  }
  0x49   : > { %308 = vadd.xlane.f32.xlu0 %v1001_v0  ;;  %701 = vmatpush3.bf16.msra.mxu0 %v772_v7  ;;  %v779_v28 = vld [vmem:[#allocation4] sm:$0xff]  }
  0x4a   : > { %702 = vmatprep.subr.bf16.mxu0 %v867_v2  ;;  %719 = vmatpush3.bf16.msra.mxu1 %v779_v28  ;;  %v783_v32 = vld [vmem:[#allocation4 + $0x20] sm:$0xff]  }
  0x4b   : > { %720 = vmatprep.subr.bf16.mxu1 %v867_v2  ;;  %v660_v36 = vld [vmem:[%s1048_s4] ss:$0 sm:$0xff] }
  0x4c   : > { %v669_v52 = vld [vmem:[%s1050_s6] ss:$0 sm:$0xff] }
  0x4d   : > { %703 = vmatpush3.bf16.msra.mxu0 %v773_v8 }
  0x4e   : > { %704 = vmatprep.subr.bf16.mxu0 %v867_v2  ;;  %721 = vmatpush3.bf16.msra.mxu1 %v780_v29 }
  0x4f   : > { %722 = vmatprep.subr.bf16.mxu1 %v867_v2 }
  0x51   : > { %705 = vmatpush3.bf16.msra.mxu0 %v774_v9 }
  0x52   : > { %706 = vmatprep.subr.bf16.mxu0 %v867_v2  ;;  %723 = vmatpush3.bf16.msra.mxu1 %v781_v30 }
  0x53   : > { %724 = vmatprep.subr.bf16.mxu1 %v867_v2 }
  0x55   : > { %707 = vmatpush3.bf16.msra.mxu0 %v775_v10 }
  0x56   : > { %708 = vmatprep.subr.bf16.mxu0 %v867_v2  ;;  %725 = vmatpush3.bf16.msra.mxu1 %v782_v31 }
  0x57   : > { %726 = vmatprep.subr.bf16.mxu1 %v867_v2 }
  0x59   : > { %709 = vmatpush3.bf16.msra.mxu0 %v776_v11 }
  0x5a   : > { %710 = vmatprep.subr.bf16.mxu0 %v867_v2  ;;  %727 = vmatpush3.bf16.msra.mxu1 %v783_v32 }
  0x5b   : > { %728 = vmatprep.subr.bf16.mxu1 %v867_v2 }
  0x5d   : > { %711 = vmatpush3.bf16.msra.mxu0 %v777_v12 }
  0x5e   : > { %712 = vmatprep.subr.bf16.mxu0 %v867_v2  ;;  %729 = vmatpush3.bf16.msra.mxu1 %v784_v33 }
  0x5f   : > { %730 = vmatprep.subr.bf16.mxu1 %v867_v2 }
  0x61   : > { %713 = vmatpush3.bf16.msra.mxu0 %v778_v13 }
  0x62   : > { %731 = vmatpush3.bf16.msra.mxu1 %v785_v34 }
  0x63   : > { %732 = vmatprep.subr.bf16.mxu1 %v867_v2 }
  0x66   : > { %733 = vmatpush3.bf16.msra.mxu1 %v786_v35 }
  0xd6   : > { %v309_v3 = vpop.xlane.xlu0 %308 }
  0xd7   : > { %v310_v4 = vmul.f32 0.03125, %v309_v3 }
  0xd9   : > { %v311_v5 = vsub.f32 %v1001_v0, %v310_v4  ;;  %v315_v14 = vmul.f32 96.0, %v310_v4 }
  0xdb   : > { %v312_v6 = vmul.f32 %v311_v5, %v311_v5  ;;  %v316_v15 = vmul.f32 %v315_v14, %v310_v4 }
  0xdd   : > { %313 = vadd.xlane.f32.xlu0 %v312_v6 }
 0x16a   : > { %v314_v16 = vpop.xlane.xlu0 %313 }
 0x16b   : > { %v317_v17 = vsub.f32 %v314_v16, %v316_v15 }
 0x16d   : > { %v318_v18 = vmul.f32 0.03125, %v317_v17 }
 0x16f   : > { %v319_v19 = vmax.f32 %v318_v18, 0.0 }
 0x171   : > { %v320_v20 = vadd.f32 1e-05, %v319_v19 }
 0x173   : > { %787 = vrsqrt.f32 %v320_v20 }
 0x17d   : > { %v788_v21 = vpop.eup %787 }
 0x17e   : > { %v322_v23 = vmul.f32 %v788_v21, %v311_v5 }
 0x180   : > { %v329_v25 = vmul.f32 %v658_v22, %v322_v23 }
 0x182   : > { %v336_v26 = vadd.f32 %v659_v24, %v329_v25 }
 0x184   : > { %v337_v27 = vpack.c.bf16 %v336_v26, %v336_v26 }
 0x186   : > { %715 = vmatmul.mubr.bf16.vlgmr.msra.gmra.mrb[0].mxu0 %v337_v27 }
 0x259   : > { %v443_v37 = vpop.f32.mrb[0].mxu0 }
 0x25a   : > { %v444_v38 = vadd.f32 %v660_v36, %v443_v37  ;;  %v716_v39 = vpop.f32.mrb[1].mxu0 }
 0x25b   : > { %v446_v40 = vpop.f32.mrb[2].mxu0 }
 0x25c   : > { %v449_v41 = vmul.f32 %v444_v38, %v444_v38  ;;  %v717_v42 = vpop.f32.mrb[3].mxu0 }
 0x25e   : > { %v450_v43 = vmul.f32 %v449_v41, %v444_v38 }
 0x260   : > { %v451_v44 = vmul.f32 0.044715, %v450_v43 }
 0x262   : > { %v452_v45 = vadd.f32 %v451_v44, %v444_v38 }
 0x264   : > { %v453_v46 = vmul.f32 0.7978846, %v452_v45 }
 0x266   : > { %789 = vtanh.f32 %v453_v46 }
 0x270   : > { %v790_v47 = vpop.eup %789 }
 0x271   : > { %v455_v48 = vadd.f32 1.0, %v790_v47 }
 0x273   : > { %v456_v49 = vmul.f32 0.5, %v455_v48 }
 0x275   : > { %v457_v50 = vmul.f32 %v456_v49, %v444_v38 }
 0x277   : > { %v458_v51 = vpack.c.bf16 %v457_v50, %v457_v50 }
 0x279   : > { %735 = vmatmul.mubr.bf16.vlgmr.msra.gmra.mrb[0].mxu1 %v458_v51 }
 0x34c   : > { %v564_v53 = vpop.f32.mrb[0].mxu1 }
 0x34d   : > { %v565_v54 = vadd.f32 %v669_v52, %v564_v53  ;;  %v736_v55 = vpop.f32.mrb[1].mxu1 }
 0x34e   : > { %v567_v56 = vpop.f32.mrb[2].mxu1 }
 0x34f   : > { %v570_v57 = vadd.f32 %v565_v54, %v1001_v0  ;;  %v737_v58 = vpop.f32.mrb[3].mxu1 }
 0x351   : > { %571 = vst [vmem:[%s303_s26] sm:$0xff] %v570_v57 }
 0x352 PF: > { %s19_s24 = sadd.s32 1, %s861_s24  }
 0x353   : > { %p16_p5 = scmp.ge.s32.totalorder %s19_s24, 4  }
 0x355   :  { %18 = sbr.rel (!%p16_p5) target bundleno = 2 (0x2), region = 87 }
 0x35c   :  { %591 = vsyncpa [#allocation3], 1 }
 0x35d   :  { %593 = vsyncpa [#allocation3 + $0x1], 1 }
 0x35e   :  { %594 = vsyncpa [#allocation5], 1 }

</bundles_post_ra>
